<compile_context>
chip_gen: v5e
topology: v5e:2x2
jax: 0.10.0
libtpu: 0.0.40
codegen_flags: <defaults>
</compile_context>

<pallas_src>
import jax
import jax.numpy as jnp
from jax.experimental import pallas as pl
from jax.experimental.pallas import tpu as pltpu


def _mlp_kernel(xt_ref,
                w1_ref, b1_ref,
                w2_ref, b2_ref,
                w3_ref, b3_ref,
                w4_ref, b4_ref,
                o_ref):
    """One row-tile of the 4-layer MLP, computed in transposed (H, TM) layout."""
    a = xt_ref[...]                                                   # (H, TM) bf16/f32

    # Layer 1: (H, H) @ (H, TM) -> (H, TM), f32 accumulate, bias col broadcast.
    h = jnp.dot(w1_ref[...], a, preferred_element_type=jnp.float32)
    h = jnp.maximum(h + b1_ref[...], 0.0)                             # ReLU (f32)

    # Layer 2: (H/2, H) @ (H, TM) -> (H/2, TM)
    h = jnp.dot(w2_ref[...], h.astype(w2_ref.dtype),
                preferred_element_type=jnp.float32)
    h = jnp.maximum(h + b2_ref[...], 0.0)                             # ReLU (f32)

    # Layer 3: (H/4, H/2) @ (H/2, TM) -> (H/4, TM)
    h = jnp.dot(w3_ref[...], h.astype(w3_ref.dtype),
                preferred_element_type=jnp.float32)
    h = jnp.maximum(h + b3_ref[...], 0.0)                             # ReLU (f32)

    # Layer 4 (out_features=1): off the MXU — broadcast-multiply by the weight
    # column and reduce over sublanes.  Result is already a lane-dense row.
    logits = jnp.sum(h * w4_ref[...], axis=0, keepdims=True) + b4_ref[...]  # (1, TM)
    o_ref[...] = jax.nn.sigmoid(logits)                               # Sigmoid (f32)


def decoder_layer_starting_node(x, params, *, tm=None, matmul_dtype=jnp.bfloat16):
    """Forward pass.  x: (..., H) float32.  Returns flattened (-1,) vector."""
    H = params["w1"].shape[1]            # in_features of linear1
    H2 = params["w2"].shape[0]
    H4 = params["w3"].shape[0]

    x2d = x.reshape(-1, H)
    n_rows = x2d.shape[0]

    # Row tile: multiple of 128 (lane width).  Cap keeps the double-buffered
    # x/out tiles + f32 intermediates + resident weights far below the 32 MiB
    # scoped VMEM budget even for large H (and under v7x's 64 MiB physical VMEM).
    if tm is None:
        tm = min(1024, pl.cdiv(n_rows, 128) * 128)
    assert tm % 128 == 0, "row tile must be a multiple of 128 lanes"

    n_tiles = pl.cdiv(n_rows, tm)
    n_pad = n_tiles * tm
    if n_pad != n_rows:
        x2d = jnp.pad(x2d, ((0, n_pad - n_rows), (0, 0)))

    # Transposed, matmul-dtype activations: (H, n_pad); rows live on lanes.
    xt = x2d.astype(matmul_dtype).T

    # Weights in PyTorch (out, in) layout; matmul weights cast once (halves the
    # resident VMEM footprint & HBM traffic).  Final layer + biases stay f32.
    w1 = params["w1"].astype(matmul_dtype)          # (H,  H)
    w2 = params["w2"].astype(matmul_dtype)          # (H2, H)
    w3 = params["w3"].astype(matmul_dtype)          # (H4, H2)
    w4 = params["w4"].reshape(H4, 1).astype(jnp.float32)   # (H4, 1) column
    b1 = params["b1"].reshape(H, 1).astype(jnp.float32)
    b2 = params["b2"].reshape(H2, 1).astype(jnp.float32)
    b3 = params["b3"].reshape(H4, 1).astype(jnp.float32)
    b4 = params["b4"].reshape(1, 1).astype(jnp.float32)

    const = lambda shape: pl.BlockSpec(shape, lambda i: (0, 0))   # resident in VMEM

    out = pl.pallas_call(
        _mlp_kernel,
        out_shape=jax.ShapeDtypeStruct((1, n_pad), jnp.float32),
        grid_spec=pltpu.PrefetchScalarGridSpec(
            num_scalar_prefetch=0,
            grid=(n_tiles,),
            in_specs=[
                pl.BlockSpec((H, tm), lambda i: (0, i)),          # x tile (pipelined)
                const((H, H)),  const((H, 1)),                    # w1, b1
                const((H2, H)), const((H2, 1)),                   # w2, b2
                const((H4, H2)), const((H4, 1)),                  # w3, b3
                const((H4, 1)), const((1, 1)),                    # w4, b4
            ],
            out_specs=pl.BlockSpec((1, tm), lambda i: (0, i)),    # lane-dense store
        ),
        compiler_params=pltpu.CompilerParams(
            dimension_semantics=("parallel",),
            vmem_limit_bytes=32 * 1024 * 1024,
        ),
    )(xt, w1, b1, w2, b2, w3, b3, w4, b4)

    # == out.view(-1) in PyTorch (drop the row padding).
    return out.reshape(-1)[:n_rows]


def init_params(key, hidden_dim):
    """PyTorch-Linear-style init (uniform +-1/sqrt(fan_in)), PyTorch layout:
    w_l (out_features, in_features), b_l (out_features,)."""
    dims = [
        (hidden_dim, hidden_dim),                   # linear1
        (hidden_dim // 2, hidden_dim),              # linear2
        (hidden_dim // 4, hidden_dim // 2),         # linear3
        (1, hidden_dim // 4),                       # linear4
    ]
    params = {}
    keys = jax.random.split(key, 2 * len(dims))
    for i, (fan_out, fan_in) in enumerate(dims):
        bound = 1.0 / jnp.sqrt(jnp.float32(fan_in))
        params[f"w{i + 1}"] = jax.random.uniform(
            keys[2 * i], (fan_out, fan_in), minval=-bound, maxval=bound,
            dtype=jnp.float32)
        params[f"b{i + 1}"] = jax.random.uniform(
            keys[2 * i + 1], (fan_out,), minval=-bound, maxval=bound,
            dtype=jnp.float32)
    return params


def _reference(x, params, matmul_dtype=jnp.bfloat16):
    """Pure-JAX reference with the same dtype policy as the kernel."""
    H = params["w1"].shape[1]
    h = x.reshape(-1, H)
    for l in (1, 2, 3):
        w = params[f"w{l}"].astype(matmul_dtype)            # (out, in)
        h = jnp.dot(h.astype(matmul_dtype), w.T,
                    preferred_element_type=jnp.float32)
        h = jnp.maximum(h + params[f"b{l}"][None, :], 0.0)
    logits = jnp.dot(h, params["w4"].T) + params["b4"][None, :]   # f32 final layer
    return jax.nn.sigmoid(logits).reshape(-1)


if __name__ == "__main__":
    key = jax.random.PRNGKey(0)
    k_x, k_p = jax.random.split(key)

    batch, seq, hidden_dim = 2, 8, 32
    x = jax.random.normal(k_x, (batch, seq, hidden_dim), dtype=jnp.float32)
    params = init_params(k_p, hidden_dim)

    # Exact-semantics check in f32.
    out_f32 = jax.block_until_ready(
        decoder_layer_starting_node(x, params, matmul_dtype=jnp.float32))
    ref_f32 = _reference(x, params, matmul_dtype=jnp.float32)
    assert out_f32.shape == (batch * seq,), out_f32.shape
    assert jnp.allclose(out_f32, ref_f32, atol=1e-5, rtol=1e-5), "f32 mismatch"

    # Default fast path: bf16 matmul inputs, f32 accumulate/elementwise.
    out_bf16 = jax.block_until_ready(decoder_layer_starting_node(x, params))
    ref_bf16 = _reference(x, params)
    assert out_bf16.shape == (batch * seq,), out_bf16.shape
    assert jnp.allclose(out_bf16, ref_bf16, atol=1e-3, rtol=1e-3), "bf16 mismatch"

    print("KERNEL_OK")
</pallas_src>

<mosaic_0001>
module attributes {stable_mosaic.version = 11 : i64} {
  func.func @_mlp_kernel(%arg0: i32, %arg1: memref<32x128xf32, #tpu.memory_space<vmem>>, %arg2: memref<32x32xf32, #tpu.memory_space<vmem>>, %arg3: memref<32x1xf32, #tpu.memory_space<vmem>>, %arg4: memref<16x32xf32, #tpu.memory_space<vmem>>, %arg5: memref<16x1xf32, #tpu.memory_space<vmem>>, %arg6: memref<8x16xf32, #tpu.memory_space<vmem>>, %arg7: memref<8x1xf32, #tpu.memory_space<vmem>>, %arg8: memref<8x1xf32, #tpu.memory_space<vmem>>, %arg9: memref<1x1xf32, #tpu.memory_space<vmem>>, %arg10: memref<1x128xf32, #tpu.memory_space<vmem>>) attributes {dimension_semantics = [#tpu.dimension_semantics<parallel>], iteration_bounds = array<i64: 1>, scalar_prefetch = 0 : i64, scratch_operands = 0 : i64, tpu.core_type = #tpu.core_type<tc>, window_params = [{transform_indices = @transform_0, window_bounds = array<i64: 32, 128>}, {pipeline_mode = #tpu.pipeline_mode<synchronous>, transform_indices = @transform_1, window_bounds = array<i64: 32, 32>}, {pipeline_mode = #tpu.pipeline_mode<synchronous>, transform_indices = @transform_2, window_bounds = array<i64: 32, 1>}, {pipeline_mode = #tpu.pipeline_mode<synchronous>, transform_indices = @transform_3, window_bounds = array<i64: 16, 32>}, {pipeline_mode = #tpu.pipeline_mode<synchronous>, transform_indices = @transform_4, window_bounds = array<i64: 16, 1>}, {pipeline_mode = #tpu.pipeline_mode<synchronous>, transform_indices = @transform_5, window_bounds = array<i64: 8, 16>}, {pipeline_mode = #tpu.pipeline_mode<synchronous>, transform_indices = @transform_6, window_bounds = array<i64: 8, 1>}, {pipeline_mode = #tpu.pipeline_mode<synchronous>, transform_indices = @transform_7, window_bounds = array<i64: 8, 1>}, {pipeline_mode = #tpu.pipeline_mode<synchronous>, transform_indices = @transform_8, window_bounds = array<i64: 1, 1>}, {transform_indices = @transform_9, window_bounds = array<i64: 1, 128>}]} {
    %c0 = arith.constant 0 : index
    %c0_0 = arith.constant 0 : index
    %0 = vector.load %arg1[%c0, %c0_0] : memref<32x128xf32, #tpu.memory_space<vmem>>, vector<32x128xf32>
    %c0_1 = arith.constant 0 : index
    %c0_2 = arith.constant 0 : index
    %1 = vector.load %arg2[%c0_1, %c0_2] : memref<32x32xf32, #tpu.memory_space<vmem>>, vector<32x32xf32>
    %cst = arith.constant dense<0.000000e+00> : vector<32x128xf32>
    %2 = tpu.matmul %1, %0, %cst {dimension_numbers = #tpu.dot_dimension_numbers<[1], [0], [0], [1], [0, 0, 1, 1], [], []>} : vector<32x32xf32>, vector<32x128xf32>, vector<32x128xf32> -> vector<32x128xf32>
    %c0_3 = arith.constant 0 : index
    %c0_4 = arith.constant 0 : index
    %3 = vector.load %arg3[%c0_3, %c0_4] : memref<32x1xf32, #tpu.memory_space<vmem>>, vector<32x1xf32>
    %4 = vector.broadcast %3 : vector<32x1xf32> to vector<32x128xf32>
    %5 = arith.addf %2, %4 : vector<32x128xf32>
    %cst_5 = arith.constant 0.000000e+00 : f32
    %6 = vector.broadcast %cst_5 : f32 to vector<32x128xf32>
    %7 = arith.maximumf %5, %6 : vector<32x128xf32>
    %c0_6 = arith.constant 0 : index
    %c0_7 = arith.constant 0 : index
    %8 = vector.load %arg4[%c0_6, %c0_7] : memref<16x32xf32, #tpu.memory_space<vmem>>, vector<16x32xf32>
    %cst_8 = arith.constant dense<0.000000e+00> : vector<16x128xf32>
    %9 = tpu.matmul %8, %7, %cst_8 {dimension_numbers = #tpu.dot_dimension_numbers<[1], [0], [0], [1], [0, 0, 1, 1], [], []>} : vector<16x32xf32>, vector<32x128xf32>, vector<16x128xf32> -> vector<16x128xf32>
    %c0_9 = arith.constant 0 : index
    %c0_10 = arith.constant 0 : index
    %10 = vector.load %arg5[%c0_9, %c0_10] : memref<16x1xf32, #tpu.memory_space<vmem>>, vector<16x1xf32>
    %11 = vector.broadcast %10 : vector<16x1xf32> to vector<16x128xf32>
    %12 = arith.addf %9, %11 : vector<16x128xf32>
    %cst_11 = arith.constant 0.000000e+00 : f32
    %13 = vector.broadcast %cst_11 : f32 to vector<16x128xf32>
    %14 = arith.maximumf %12, %13 : vector<16x128xf32>
    %c0_12 = arith.constant 0 : index
    %c0_13 = arith.constant 0 : index
    %15 = vector.load %arg6[%c0_12, %c0_13] : memref<8x16xf32, #tpu.memory_space<vmem>>, vector<8x16xf32>
    %cst_14 = arith.constant dense<0.000000e+00> : vector<8x128xf32>
    %16 = tpu.matmul %15, %14, %cst_14 {dimension_numbers = #tpu.dot_dimension_numbers<[1], [0], [0], [1], [0, 0, 1, 1], [], []>} : vector<8x16xf32>, vector<16x128xf32>, vector<8x128xf32> -> vector<8x128xf32>
    %c0_15 = arith.constant 0 : index
    %c0_16 = arith.constant 0 : index
    %17 = vector.load %arg7[%c0_15, %c0_16] : memref<8x1xf32, #tpu.memory_space<vmem>>, vector<8x1xf32>
    %18 = vector.broadcast %17 : vector<8x1xf32> to vector<8x128xf32>
    %19 = arith.addf %16, %18 : vector<8x128xf32>
    %cst_17 = arith.constant 0.000000e+00 : f32
    %20 = vector.broadcast %cst_17 : f32 to vector<8x128xf32>
    %21 = arith.maximumf %19, %20 : vector<8x128xf32>
    %c0_18 = arith.constant 0 : index
    %c0_19 = arith.constant 0 : index
    %22 = vector.load %arg8[%c0_18, %c0_19] : memref<8x1xf32, #tpu.memory_space<vmem>>, vector<8x1xf32>
    %23 = vector.broadcast %22 : vector<8x1xf32> to vector<8x128xf32>
    %24 = arith.mulf %21, %23 : vector<8x128xf32>
    %cst_20 = arith.constant dense<0.000000e+00> : vector<128xf32>
    %25 = vector.multi_reduction <add>, %24, %cst_20 [0] : vector<8x128xf32> to vector<128xf32>
    %26 = vector.shape_cast %25 : vector<128xf32> to vector<1x128xf32>
    %c0_21 = arith.constant 0 : index
    %c0_22 = arith.constant 0 : index
    %27 = vector.load %arg9[%c0_21, %c0_22] : memref<1x1xf32, #tpu.memory_space<vmem>>, vector<1x1xf32>
    %28 = vector.broadcast %27 : vector<1x1xf32> to vector<1x128xf32>
    %29 = arith.addf %26, %28 : vector<1x128xf32>
    %30 = arith.negf %29 : vector<1x128xf32>
    %31 = math.exp %30 : vector<1x128xf32>
    %cst_23 = arith.constant 1.000000e+00 : f32
    %32 = vector.broadcast %cst_23 : f32 to vector<1x128xf32>
    %33 = arith.addf %32, %31 : vector<1x128xf32>
    %34 = arith.divf %32, %33 : vector<1x128xf32>
    %c0_24 = arith.constant 0 : index
    %c0_25 = arith.constant 0 : index
    %35 = vector.load %arg10[%c0_24, %c0_25] : memref<1x128xf32, #tpu.memory_space<vmem>>, vector<1x128xf32>
    tpu.vector_store %arg10[%c0_24, %c0_25], %34 {strides = array<i32>} : memref<1x128xf32, #tpu.memory_space<vmem>>, vector<1x128xf32>,
    return
  }
  func.func @transform_0(%arg0: i32) -> (i32, i32) {
    %c0_i32 = arith.constant 0 : i32
    %c0_i32_0 = arith.constant 0 : i32
    return %c0_i32, %arg0 : i32, i32
  }
  func.func @transform_1(%arg0: i32) -> (i32, i32) {
    %c0_i32 = arith.constant 0 : i32
    %c0_i32_0 = arith.constant 0 : i32
    %c0_i32_1 = arith.constant 0 : i32
    return %c0_i32, %c0_i32_0 : i32, i32
  }
  func.func @transform_2(%arg0: i32) -> (i32, i32) {
    %c0_i32 = arith.constant 0 : i32
    %c0_i32_0 = arith.constant 0 : i32
    %c0_i32_1 = arith.constant 0 : i32
    return %c0_i32, %c0_i32_0 : i32, i32
  }
  func.func @transform_3(%arg0: i32) -> (i32, i32) {
    %c0_i32 = arith.constant 0 : i32
    %c0_i32_0 = arith.constant 0 : i32
    %c0_i32_1 = arith.constant 0 : i32
    return %c0_i32, %c0_i32_0 : i32, i32
  }
  func.func @transform_4(%arg0: i32) -> (i32, i32) {
    %c0_i32 = arith.constant 0 : i32
    %c0_i32_0 = arith.constant 0 : i32
    %c0_i32_1 = arith.constant 0 : i32
    return %c0_i32, %c0_i32_0 : i32, i32
  }
  func.func @transform_5(%arg0: i32) -> (i32, i32) {
    %c0_i32 = arith.constant 0 : i32
    %c0_i32_0 = arith.constant 0 : i32
    %c0_i32_1 = arith.constant 0 : i32
    return %c0_i32, %c0_i32_0 : i32, i32
  }
  func.func @transform_6(%arg0: i32) -> (i32, i32) {
    %c0_i32 = arith.constant 0 : i32
    %c0_i32_0 = arith.constant 0 : i32
    %c0_i32_1 = arith.constant 0 : i32
    return %c0_i32, %c0_i32_0 : i32, i32
  }
  func.func @transform_7(%arg0: i32) -> (i32, i32) {
    %c0_i32 = arith.constant 0 : i32
    %c0_i32_0 = arith.constant 0 : i32
    %c0_i32_1 = arith.constant 0 : i32
    return %c0_i32, %c0_i32_0 : i32, i32
  }
  func.func @transform_8(%arg0: i32) -> (i32, i32) {
    %c0_i32 = arith.constant 0 : i32
    %c0_i32_0 = arith.constant 0 : i32
    %c0_i32_1 = arith.constant 0 : i32
    return %c0_i32, %c0_i32_0 : i32, i32
  }
  func.func @transform_9(%arg0: i32) -> (i32, i32) {
    %c0_i32 = arith.constant 0 : i32
    %c0_i32_0 = arith.constant 0 : i32
    return %c0_i32, %arg0 : i32, i32
  }
}

</mosaic_0001>

<bundles_post_ra>
// kernel: tpu_custom_call.1
= control target key start
LH: loop header
LB: loop body
LE: loop exit
PB: predicated region body
PF: predicated region fallthrough
CT: control target
= control target key end

     0   :  { %s455_s0 = inlined_call_operand.vmem [shape: f32[32,128], index: 0, kind: input, shape index: {}]   ;;  %s456_s1 = inlined_call_operand.hbm [shape: f32[32,32], index: 1, kind: input, shape index: {}]   ;;  %s457_s2 = inlined_call_operand.vmem [shape: f32[32,1], index: 2, kind: input, shape index: {}]   ;;  %s458_s3 = inlined_call_operand.vmem [shape: f32[16,32], index: 3, kind: input, shape index: {}]   ;;  %s459_s4 = inlined_call_operand.vmem [shape: f32[16,1], index: 4, kind: input, shape index: {}]   ;;  %s460_s5 = inlined_call_operand.vmem [shape: f32[8,16], index: 5, kind: input, shape index: {}]   ;;  %s461_s6 = inlined_call_operand.vmem [shape: f32[8,1], index: 6, kind: input, shape index: {}]   ;;  %s462_s7 = inlined_call_operand.vmem [shape: f32[8,1], index: 7, kind: input, shape index: {}]   ;;  %s463_s8 = inlined_call_operand.<no memory space> [shape: f32[1,1], index: 8, kind: input, shape index: {}]   ;;  %s464_s9 = inlined_call_operand.hbm [shape: f32[1,128], index: 9, kind: output, shape index: {}]  }
   0x1   :  { %v14_v0 = vstv %s463_s8 }
   0x2   :  { %15 = vst [vmem:[#allocation2] sm:$0x1] %v14_v0 }
   0x3   :  { %16 = vsyncpa [#allocation4], 0 }
   0x4   :  { %17 = vsyncpa [#allocation5], 0  ;;  %s24_s13 = sshll.u32 %s456_s1, 4  ;;  %s340_s14 = smov [#allocation3]   ;;  %s25_s13 = int_to_ptr.hbm [resolvable:$true] %s24_s13 }
   0x5   :  { %s26_s15 = sshll.u32 %s340_s14, 4  ;;  %s341_s16 = smov 128   ;;  %s27_s15 = int_to_ptr.vmem [resolvable:$true] %s26_s15 }
   0x6   :  { %s342_s17 = smov 8  }
   0x7   :  { %32 = dma.hbm_to_vmem [thread:$0]  %s25_s13, 512, %s27_s15, [#allocation4], %s341_s16, %s341_s16, %s342_s17  }
   0x8   :  { %336 = dma.done.wait [#allocation4], 512  }
   0x9   :  { %337 = vsyncadd [#allocation4], 4294966784  ;;  %v343_v1 = vmov 0   ;;  %v54_v2 = vld [vmem:[%s455_s0 + $0x18] sm:$0xff]  ;;  %v53_v3 = vld [vmem:[%s455_s0 + $0x10] sm:$0xff]  ;;  %vm83_vm0 = vcmask 261120  }
   0xa   :  { %281 = vset.pattern.permute.xlu0 %v343_v1  ;;  %282 = vset.pattern.permute.xlu1 %v343_v1  ;;  %v62_v4 = vld [vmem:[%s457_s2 + $0x18] sm:$0xff]  ;;  %v52_v5 = vld [vmem:[%s455_s0 + $0x8] sm:$0xff]  ;;  %v51_v7 = vld [vmem:[%s455_s0] sm:$0xff]  ;;  %vm181_vm1 = vcmask 130048   ;;  %s254_s1 = sshll.u32 %s464_s9, 4  ;;  %s255_s1 = int_to_ptr.hbm [resolvable:$true] %s254_s1 }
   0xb   :  { %283 = vset.pattern.permute.xlu2 %v343_v1  ;;  %272 = vmatpush.msra.mxu3 %v54_v2  ;;  %v60_v6 = vld [vmem:[%s457_s2 + $0x8] sm:$0xff]  ;;  %v57_v8 = vld [vmem:[#allocation3 + $0x10] sm:$0xff]  ;;  %v59_v11 = vld [vmem:[%s457_s2] sm:$0xff] }
   0xc   :  { %108 = vmatpush.msra.mxu0 %v54_v2  ;;  %80 = vperm.xlu0 %281, %v62_v4   ;;  %v55_v9 = vld [vmem:[#allocation3] sm:$0xff]  ;;  %v61_v10 = vld [vmem:[%s457_s2 + $0x10] sm:$0xff]  ;;  %v58_v12 = vld [vmem:[#allocation3 + $0x18] sm:$0xff] }
   0xd   :  { %273 = vmatpush.msra.mxu3 %v53_v3  ;;  %70 = vperm.xlu1 %282, %v60_v6   ;;  %v56_v13 = vld [vmem:[#allocation3 + $0x8] sm:$0xff]  ;;  %v175_v14 = vld [vmem:[%s461_s6] sm:$0xff] }
   0xe   :  { %109 = vmatpush.msra.mxu0 %v53_v3  ;;  %v206_v15 = vld [vmem:[%s462_s7] sm:$0xff]  ;;  %v132_v16 = vld [vmem:[%s459_s4 + $0x8] sm:$0xff] }
   0xf   :  { %274 = vmatpush.msra.mxu3 %v52_v5  ;;  %140 = vperm.xlu2 %283, %v132_v16   ;;  %v131_v21 = vld [vmem:[%s459_s4] sm:$0xff]  ;;  %v130_v36 = vld [vmem:[%s458_s3 + $0x8] sm:$0xff] }
  0x10   :  { %110 = vmatpush.msra.mxu0 %v52_v5  ;;  %v219_v27 = vld [vmem:[#allocation2] sm:$0x1] }
  0x11   :  { %275 = vmatpush.msra.mxu3 %v51_v7  ;;  %v129_v35 = vld [vmem:[%s458_s3] sm:$0xff]  ;;  %s344_s3 = smov [#allocation6]  }
  0x12   :  { %111 = vmatpush.msra.mxu0 %v51_v7  ;;  %266 = vmatmul.msk.f32.vlgmr.msra.gmra.mxu3 %vm83_vm0, %v57_v8  ;;  %v174_v45 = vld [vmem:[%s460_s5] sm:$0xff]  ;;  %s252_s5 = sshll.u32 %s344_s3, 4  ;;  %s253_s5 = int_to_ptr.vmem [resolvable:$true] %s252_s5 }
  0x13   :  { %264 = vmatmul.msk.f32.vlgmr.msra.gmra.mxu0 %vm83_vm0, %v55_v9 }
  0x14   :  { %75 = vperm.xlu0 %281, %v61_v10  }
  0x15   :  { %65 = vperm.xlu1 %282, %v59_v11  }
  0x17   :  { %135 = vperm.xlu2 %283, %v131_v21  }
  0x1a   :  { %267 = vmatmul.msk.f32.gmra.mxu3 %vm83_vm0, %v58_v12 }
  0x1b   :  { %265 = vmatmul.msk.f32.gmra.mxu0 %vm83_vm0, %v56_v13 }
  0x1c   :  { %178 = vperm.xlu0 %281, %v175_v14  }
  0x1d   :  { %209 = vperm.xlu1 %282, %v206_v15  }
  0x1f   :  { %222 = vperm.xlu2 %283, %v219_v27  }
  0x69   :  { %v141_v37 = vpop.permute.xlu2 %140 }
  0x71   :  { %v136_v39 = vpop.permute.xlu2 %135 }
  0x79   :  { %v223_v56 = vpop.permute.xlu2 %222 }
  0x7a   :  { %v225_v58 = vperm.slane %v223_v56, 0 }
  0x7e   :  { %v81_v17 = vpop.permute.xlu0 %80 }
  0x7f   :  { %v71_v20 = vpop.permute.xlu1 %70 }
  0x86   :  { %v76_v22 = vpop.permute.xlu0 %75 }
  0x87   :  { %v66_v30 = vpop.permute.xlu1 %65 }
  0x8e   :  { %v179_v46 = vpop.permute.xlu0 %178 }
  0x8f   :  { %v210_v50 = vpop.permute.xlu1 %209 }
  0x90   :  { %v113_v18 = vpop.f32.mrf.mxu0 }
  0x91   :  { %v114_v31 = vadd.f32 %v113_v18, %v66_v30 }
  0x93   :  { %v125_v34 = vmax.f32 %v114_v31, 0.0 }
  0x95   :  { %v119_v19 = vpop.f32.mrf.mxu3 }
  0x96   :  { %v120_v25 = vadd.f32 %v119_v19, %v76_v22 }
  0x98   :  { %v116_v23 = vpop.f32.mrf.mxu0  ;;  %v127_v32 = vmax.f32 %v120_v25, 0.0 }
  0x99   :  { %v117_v28 = vadd.f32 %v116_v23, %v71_v20 }
  0x9b   :  { %v126_v33 = vmax.f32 %v117_v28, 0.0 }
  0x9d   :  { %v122_v24 = vpop.f32.mrf.mxu3 }
  0x9e   :  { %v123_v26 = vadd.f32 %v122_v24, %v81_v17 }
  0xa0   :  { %v128_v29 = vmax.f32 %v123_v26, 0.0 }
  0xa2   :  { %161 = vmatpush.msra.mxu1 %v128_v29 }
  0xa4   :  { %162 = vmatpush.msra.mxu1 %v127_v32 }
  0xa6   :  { %163 = vmatpush.msra.mxu1 %v126_v33 }
  0xa8   :  { %164 = vmatpush.msra.mxu1 %v125_v34 }
  0xa9   :  { %268 = vmatmul.msk.f32.vlgmr.msra.gmra.mxu1 %vm83_vm0, %v129_v35 }
  0xb1   :  { %269 = vmatmul.msk.f32.gmra.mxu1 %vm83_vm0, %v130_v36 }
 0x126   :  { %v166_v38 = vpop.f32.mrf.mxu1 }
 0x127   :  { %v167_v41 = vadd.f32 %v166_v38, %v136_v39 }
 0x129   :  { %v172_v44 = vmax.f32 %v167_v41, 0.0 }
 0x12e   :  { %v169_v40 = vpop.f32.mrf.mxu1 }
 0x12f   :  { %v170_v42 = vadd.f32 %v169_v40, %v141_v37 }
 0x131   :  { %v173_v43 = vmax.f32 %v170_v42, 0.0 }
 0x133   :  { %199 = vmatpush.msra.mxu2 %v173_v43 }
 0x135   :  { %200 = vmatpush.msra.mxu2 %v172_v44 }
 0x136   :  { %270 = vmatmul.msk.f32.vlgmr.msra.gmra.mxu2 %vm181_vm1, %v174_v45 }
 0x1b9   :  { %v202_v47 = vpop.f32.mrf.mxu2 }
 0x1ba   :  { %v203_v48 = vadd.f32 %v202_v47, %v179_v46 }
 0x1bc   :  { %v205_v49 = vmax.f32 %v203_v48, 0.0 }
 0x1be   :  { %v212_v51 = vmul.f32 %v210_v50, %v205_v49 }
 0x1c0   :  { %v213_v52 = vrot.slane %v212_v51, 4 }
 0x1c2   :  { %v214_v53 = vadd.f32 %v213_v52, %v212_v51 }
 0x1c4   :  { %v215_v54 = vrot.slane %v214_v53, 2 }
 0x1c6   :  { %v216_v55 = vadd.f32 %v215_v54, %v214_v53 }
 0x1c8   :  { %v217_v57 = vrot.slane %v216_v55, 1 }
 0x1ca   :  { %v218_v59 = vadd.f32 %v217_v57, %v216_v55 }
 0x1cc   :  { %v226_v60 = vadd.f32 %v225_v58, %v218_v59 }
 0x1ce   :  { %v271_v61 = vmul.f32 -1.442695, %v226_v60 }
 0x1d0   :  { %284 = vpow2.f32 %v271_v61 }
 0x1d6   :  { %v285_v62 = vpop.eup %284 }
 0x1d7   :  { %v230_v63 = vadd.f32 1.0, %v285_v62 }
 0x1d9   :  { %286 = vrcp.f32 %v230_v63  ;;  %v242_v3 = vand.u32 2147483648, %v230_v63  ;;  %v240_v5 = vand.u32 2147483647, %v230_v63  ;;  %vm236_vm3 = vweird.f32 %v230_v63 }
 0x1db   :  { %v243_v7 = vor.u32 1.1754944e-38, %v242_v3  ;;  %vm241_vm5 = vcmp.eq.f32.partialorder %v240_v5, 8.507059e+37 }
 0x1df   :  { %v287_v0 = vpop.eup %286 }
 0x1e0   :  { %v232_v1 = vmul.f32 %v287_v0, %v230_v63  ;;  %vm237_vm2 = vweird.f32 %v287_v0 }
 0x1e1   :  { %vm238_vm4 = vmor %vm236_vm3, %vm237_vm2 }
 0x1e2   :  { %v233_v2 = vsub.f32 1.0, %v232_v1 }
 0x1e4   :  { %v234_v4 = vmul.f32 %v287_v0, %v233_v2 }
 0x1e6   :  { %v235_v6 = vadd.f32 %v287_v0, %v234_v4 }
 0x1e8   :  { %v239_v8 = vsel %vm238_vm4, %v287_v0, %v235_v6 }
 0x1e9   :  { %v244_v9 = vsel %vm241_vm5, %v243_v7, %v239_v8 }
 0x1ea   :  { %246 = vst [vmem:[#allocation6] sm:$0x1] %v244_v9 }
 0x1eb   :  { %257 = dma.vmem_to_hbm [thread:$0]  %s253_s5, 16, %s255_s1, [#allocation5]  }
 0x1ec   :  { %338 = dma.done.wait [#allocation5], 16  }
 0x1ed   :  { %339 = vsyncadd [#allocation5], 4294967280 }
 0x1ee   :  { %262 = vsyncpa [#allocation4], 1 }
 0x1ef   :  { %263 = vsyncpa [#allocation5], 1 }

</bundles_post_ra>
